<compile_context>
chip_gen: v7x
topology: tpu7x:2x2x1
jax: 0.10.0
libtpu: 0.0.40
codegen_flags: <defaults>
</compile_context>

<pallas_src>
import jax
import jax.numpy as jnp
from jax.experimental import pallas as pl
from jax.experimental.pallas import tpu as pltpu


def identity_kernel(x_ref, o_ref):
    # Copy of the current VMEM tile -- the entire "compute" of Identity.
    o_ref[...] = x_ref[...]


def _run_copy(x2):
    """Run the lane-dense tiled copy kernel on a 2-D (rows, LANE) slab."""
    rows, lane = x2.shape
    itemsize = jnp.dtype(x2.dtype).itemsize

    # Packed-sublane multiple per dtype (32-bit: 8, 16-bit: 16, 8-bit: 32).
    sublane = {4: 8, 2: 16, 1: 32}.get(itemsize, 8)

    # Size the row-block by bytes: ~2 MiB per tile. With input + output each
    # double-buffered (4 live buffers) that is ~8 MiB of VMEM -- safely under
    # every generation's default scoped VMEM limit.
    target_bytes = 2 * 1024 * 1024
    block_rows = max(1, target_bytes // (lane * itemsize))
    if block_rows >= rows:
        block_rows = rows  # full extent: no (8,*) divisibility requirement
    else:
        block_rows = max(sublane, (block_rows // sublane) * sublane)

    grid = (pl.cdiv(rows, block_rows),)

    return pl.pallas_call(
        identity_kernel,
        out_shape=jax.ShapeDtypeStruct((rows, lane), x2.dtype),
        grid_spec=pltpu.PrefetchScalarGridSpec(
            num_scalar_prefetch=0,
            grid=grid,
            in_specs=[pl.BlockSpec((block_rows, lane), lambda i: (i, 0))],
            out_specs=pl.BlockSpec((block_rows, lane), lambda i: (i, 0)),
        ),
        # Output aliases the (intermediate) input slab: no extra HBM output
        # buffer is allocated for the result of the copy.
        input_output_aliases={0: 0},
        compiler_params=pltpu.CompilerParams(
            dimension_semantics=("parallel",),
        ),
    )(x2)


def identity(x):
    """Identity forward pass. Semantics: return x unchanged (shape & dtype)."""
    orig_shape = x.shape
    total = x.size
    if total == 0:
        return x  # nothing to copy

    x_flat = x.reshape(-1)

    # Lane-dense reshape: widest lane count (multiple of 128, capped at 1024
    # so a single row block can never blow VMEM) that divides the element
    # count exactly.
    lane = None
    for cand in (1024, 512, 256, 128):
        if total % cand == 0:
            lane = cand
            break

    if lane is None:
        # Ragged element count: pad to a multiple of 128 lanes, copy, slice.
        pad = (-total) % 128
        x_pad = jnp.pad(x_flat, (0, pad))
        out = _run_copy(x_pad.reshape(-1, 128))
        return out.reshape(-1)[:total].reshape(orig_shape)

    out = _run_copy(x_flat.reshape(-1, lane))
    return out.reshape(orig_shape)


if __name__ == "__main__":
    key = jax.random.PRNGKey(0)
    # Small NCHW input consistent with a conv-style module: batch=2, ch=4, 16x16
    x = jax.random.normal(key, (2, 4, 16, 16), dtype=jnp.float32)

    # jit so the reshapes are free and the aliased output binds to an
    # intermediate buffer (x itself is not donated and stays valid).
    y = jax.jit(identity)(x)
    jax.block_until_ready(y)

    assert y.shape == x.shape and y.dtype == x.dtype
    assert bool(jnp.all(y == x))
    print("KERNEL_OK")
</pallas_src>

<mosaic_0001>
module attributes {stable_mosaic.version = 11 : i64} {
  func.func @identity_kernel(%arg0: i32, %arg1: memref<2x1024xf32, #tpu.memory_space<vmem>>, %arg2: memref<2x1024xf32, #tpu.memory_space<vmem>>) attributes {dimension_semantics = [#tpu.dimension_semantics<parallel>], iteration_bounds = array<i64: 1>, scalar_prefetch = 0 : i64, scratch_operands = 0 : i64, tpu.core_type = #tpu.core_type<tc>, window_params = [{transform_indices = @transform_0, window_bounds = array<i64: 2, 1024>}, {transform_indices = @transform_1, window_bounds = array<i64: 2, 1024>}]} {
    %c0 = arith.constant 0 : index
    %c0_0 = arith.constant 0 : index
    %0 = vector.load %arg1[%c0, %c0_0] : memref<2x1024xf32, #tpu.memory_space<vmem>>, vector<2x1024xf32>
    %c0_1 = arith.constant 0 : index
    %c0_2 = arith.constant 0 : index
    %1 = vector.load %arg2[%c0_1, %c0_2] : memref<2x1024xf32, #tpu.memory_space<vmem>>, vector<2x1024xf32>
    tpu.vector_store %arg2[%c0_1, %c0_2], %0 {strides = array<i32>} : memref<2x1024xf32, #tpu.memory_space<vmem>>, vector<2x1024xf32>,
    return
  }
  func.func @transform_0(%arg0: i32) -> (i32, i32) {
    %c0_i32 = arith.constant 0 : i32
    %c0_i32_0 = arith.constant 0 : i32
    return %arg0, %c0_i32 : i32, i32
  }
  func.func @transform_1(%arg0: i32) -> (i32, i32) {
    %c0_i32 = arith.constant 0 : i32
    %c0_i32_0 = arith.constant 0 : i32
    return %arg0, %c0_i32 : i32, i32
  }
}

</mosaic_0001>

<bundles_post_ra>
// kernel: identity.1
= control target key start
LH: loop header
LB: loop body
LE: loop exit
PB: predicated region body
PF: predicated region fallthrough
CT: control target
= control target key end

     0   :  { %s38_s0 = inlined_call_operand.vmem [shape: f32[2,1024], index: 0, kind: input, shape index: {}, may-alias: {0,1}]   ;;  %s39_s1 = inlined_call_operand.vmem [shape: f32[2,1024], index: 1, kind: output, shape index: {}, may-alias: {0,1}]  }
   0x1   :  { %v8_v0 = vld [vmem:[%s38_s0] sm:$0xff]  ;;  %v9_v1 = vld [vmem:[%s38_s0 + $0x8] sm:$0xff] }
   0x2   :  { %10 = vst [vmem:[%s39_s1] sm:$0xff] %v8_v0  ;;  %11 = vst [vmem:[%s39_s1 + $0x8] sm:$0xff] %v9_v1 }

</bundles_post_ra>
